<compile_context>
chip_gen: v7x
topology: tpu7x:2x2x1
jax: 0.10.0
libtpu: 0.0.40
codegen_flags: <defaults>
</compile_context>

<pallas_src>
import functools

import jax
import jax.numpy as jnp
from jax.experimental import pallas as pl
from jax.experimental.pallas import tpu as pltpu

_LANE = 128
_MiB = 1024 * 1024


def _round_up(x, m):
    return ((x + m - 1) // m) * m


def _sublane_multiple(itemsize):
    # f32 -> 8, bf16/f16 -> 16, int8/fp8 -> 32 (sub-32-bit dtypes pack sublanes).
    return 8 * max(1, 4 // int(itemsize))


def _vmem_capacity_bytes():
    try:
        info = pltpu.get_tpu_info()
        for attr in ("vmem_capacity_bytes", "vmem_bytes", "vmem_size_bytes"):
            v = getattr(info, attr, None)
            if v:
                return int(v)
    except Exception:
        pass
    return 64 * _MiB  # conservative fallback (v7x per-TensorCore VMEM)


def _vmem_caps():
    cap = _vmem_capacity_bytes()
    # Scoped-VMEM target: 64 MiB on 128-MiB parts (v5e/v6e), 48 MiB on 64-MiB
    # parts (v7x) -- leaves headroom for Mosaic internal scratch / XLA.
    target = max(cap // 2, min(48 * _MiB, (3 * cap) // 4))
    return cap, target


def _choose_tiles(N, L, itemsize):
    """Pick (tn, tl) from *padded* VMEM bytes, per TPU generation.

    Footprint model per input block of `blk` padded bytes:
        2 inputs x 2 pipeline buffers  -> 4 * blk            (input dtype)
      + ~4 live block-sized f32 temps  -> 4 * blk_f32        (in-kernel chain)
      + 16 MiB margin                                          (outputs, misc)
    kept inside the generation-specific scoped-VMEM target.
    """
    _, target = _vmem_caps()
    margin = 16 * _MiB
    sub = _sublane_multiple(itemsize)
    # Padded elements per input block.
    elems_budget = max(64 * 1024, (target - margin) // (4 * itemsize + 4 * 4))

    if L <= _LANE:
        tl = L                                    # full (only legal) lane block
    else:
        n_lane_tiles = pl.cdiv(L, _LANE)
        budget_tiles = max(1, (elems_budget // sub) // _LANE)
        # Keep >= 2 grid steps along L so both v7x TensorCores get work even
        # when the batch axis collapses to a single tile.
        tgt_tiles = min(n_lane_tiles, budget_tiles, pl.cdiv(n_lane_tiles, 2))
        tl = max(1, tgt_tiles) * _LANE

    rows_budget = max(sub, elems_budget // _round_up(tl, _LANE))
    if N <= rows_budget:
        tn = N                                    # full dim: no sublane constraint
    else:
        tn = max(sub, (rows_budget // sub) * sub)
    return tn, tl


def _vmem_limit_bytes(tn, tl, itemsize):
    cap, target = _vmem_caps()
    sub = _sublane_multiple(itemsize)
    blk_elems = _round_up(tn, sub) * _round_up(tl, _LANE)
    need = 4 * blk_elems * itemsize + 4 * blk_elems * 4 + 16 * _MiB
    return int(min(max(target, need), (cap * 9) // 10))


def _scaled_mse_partial_kernel(t_ref, o_ref, out_ref, *,
                               n_valid, l_valid, tile_n, tile_l,
                               mask_n, mask_l):
    """Per-(i, j) partial sum of ((t - o) / t)^2 over one (tile_n, tile_l) block."""
    i = pl.program_id(0)
    j = pl.program_id(1)

    t = t_ref[...].astype(jnp.float32)
    o = o_ref[...].astype(jnp.float32)

    if mask_n or mask_l:
        mask = None
        if mask_n:
            row = jax.lax.broadcasted_iota(jnp.int32, t.shape, 0) + i * tile_n
            mask = row < n_valid
        if mask_l:
            col = jax.lax.broadcasted_iota(jnp.int32, t.shape, 1) + j * tile_l
            m = col < l_valid
            mask = m if mask is None else (mask & m)
        # Keep the reciprocal finite on the padded region; genuine zeros in
        # target[:,0] still yield inf/NaN (matches PyTorch semantics).
        t = jnp.where(mask, t, 1.0)
        r = (t - o) * pl.reciprocal(t, approx=False)   # EUP reciprocal + VPU mul
        val = jnp.where(mask, r * r, 0.0)
    else:
        r = (t - o) * pl.reciprocal(t, approx=False)
        val = r * r

    # One cross-lane reduce per grid step (XLU slot is idle in this VPU-only,
    # HBM-bound kernel).  Broadcast into a full (8, 128) slab so the writeback
    # is a lane-dense unmasked store.
    out_ref[...] = jnp.full(out_ref.shape, jnp.sum(val), dtype=jnp.float32)


def scaled_mse_loss(target, output, *, tile_n=None, tile_l=None):
    """target, output: (N, C, ...) arrays (PyTorch NCHW).  Returns scalar f32."""
    assert target.shape == output.shape and target.ndim >= 2
    assert target.dtype == output.dtype
    N = target.shape[0]

    # Channel-0 selection + flatten to a lane-dense (N, L) slab.  The channel-0
    # plane is contiguous per batch element in NCHW, so this is one cheap
    # strided copy in XLA; inside the kernel it buys full-lane vregs and
    # unstrided DMA when the trailing dim is << 128.
    t0 = jnp.reshape(target[:, 0], (N, -1))
    o0 = jnp.reshape(output[:, 0], (N, -1))
    L = t0.shape[1]

    itemsize = jnp.dtype(t0.dtype).itemsize
    sub = _sublane_multiple(itemsize)
    tn_def, tl_def = _choose_tiles(N, L, itemsize)
    tn = tile_n if tile_n is not None else tn_def
    tl = tile_l if tile_l is not None else tl_def
    if tn != N:
        assert tn % sub == 0 and tn <= N, (
            f"tile_n must equal N or be a multiple of {sub} (dtype sublane pack)")
    if tl != L:
        assert tl % _LANE == 0 and tl <= L, (
            "tile_l must equal L or be a multiple of 128")

    n_i = pl.cdiv(N, tn)
    n_l = pl.cdiv(L, tl)

    kernel = functools.partial(
        _scaled_mse_partial_kernel,
        n_valid=N, l_valid=L, tile_n=tn, tile_l=tl,
        mask_n=(N % tn != 0), mask_l=(L % tl != 0))

    in_spec = pl.BlockSpec((tn, tl), lambda i, j: (i, j))

    partials = pl.pallas_call(
        kernel,
        out_shape=jax.ShapeDtypeStruct((n_i, n_l, 8, _LANE), jnp.float32),
        grid_spec=pltpu.PrefetchScalarGridSpec(
            num_scalar_prefetch=0,
            grid=(n_i, n_l),
            in_specs=[in_spec, in_spec],
            out_specs=pl.BlockSpec((1, 1, 8, _LANE), lambda i, j: (i, j, 0, 0)),
        ),
        compiler_params=pltpu.CompilerParams(
            dimension_semantics=("parallel", "parallel"),
            vmem_limit_bytes=_vmem_limit_bytes(tn, tl, itemsize),
        ),
    )(t0, o0)

    # Tiny final combine in plain JAX (per-(i, j) partials -> better summation
    # tree than one long running sum); divisor is the true element count.
    return jnp.sum(partials[:, :, 0, 0]) / jnp.float32(N * L)


if __name__ == "__main__":
    def ref_loss(t, o):
        t0 = t[:, 0].astype(jnp.float32)
        o0 = o[:, 0].astype(jnp.float32)
        return jnp.mean((t0 - o0) ** 2 / t0 ** 2)

    def check(name, t, o, **kw):
        got = scaled_mse_loss(t, o, **kw)
        jax.block_until_ready(got)
        want = ref_loss(t, o)
        assert jnp.allclose(got, want, rtol=1e-5, atol=1e-6), (name, got, want)

    k1, k2, k3, k4, k5, k6, k7, k8 = jax.random.split(jax.random.PRNGKey(0), 8)

    # Case 1: module-implied NCHW shape; default tiling (lane-dense L tiles).
    t = jax.random.uniform(k1, (2, 4, 16, 16), jnp.float32, minval=0.5, maxval=2.0)
    o = t + 0.1 * jax.random.normal(k2, t.shape, jnp.float32)
    check("case1", t, o)

    # Case 2: L = 20*16 = 320 is not a multiple of the 128-wide L tile
    # -> exercises the L-remainder masking path (3 grid steps along L).
    t = jax.random.uniform(k3, (5, 3, 20, 16), jnp.float32, minval=0.5, maxval=2.0)
    o = t + 0.05 * jax.random.normal(k4, t.shape, jnp.float32)
    check("case2", t, o, tile_l=128)

    # Case 3: batch tiled with a remainder (N=10, tile_n=8)
    # -> exercises the N-remainder masking path.
    t = jax.random.uniform(k5, (10, 2, 4, 8), jnp.float32, minval=0.5, maxval=2.0)
    o = t + 0.05 * jax.random.normal(k6, t.shape, jnp.float32)
    check("case3", t, o, tile_n=8)

    # Case 4: bf16 storage (16-row sublane packing path), cast to f32 in-kernel.
    t = jax.random.uniform(k7, (4, 3, 16, 16), jnp.float32,
                           minval=0.5, maxval=2.0).astype(jnp.bfloat16)
    o = (t.astype(jnp.float32)
         + 0.05 * jax.random.normal(k8, t.shape, jnp.float32)).astype(jnp.bfloat16)
    check("case4", t, o)

    print("KERNEL_OK")
</pallas_src>

<mosaic_0001>
module attributes {stable_mosaic.version = 11 : i64} {
  func.func @_scaled_mse_partial_kernel(%arg0: i32, %arg1: i32, %arg2: memref<2x128xf32, #tpu.memory_space<vmem>>, %arg3: memref<2x128xf32, #tpu.memory_space<vmem>>, %arg4: memref<1x1x8x128xf32, #tpu.memory_space<vmem>>) attributes {dimension_semantics = [#tpu.dimension_semantics<parallel>, #tpu.dimension_semantics<parallel>], iteration_bounds = array<i64: 1, 2>, scalar_prefetch = 0 : i64, scratch_operands = 0 : i64, tpu.core_type = #tpu.core_type<tc>, window_params = [{transform_indices = @transform_0, window_bounds = array<i64: 2, 128>}, {transform_indices = @transform_1, window_bounds = array<i64: 2, 128>}, {transform_indices = @transform_2, window_bounds = array<i64: 1, 1, 8, 128>}]} {
    %c0 = arith.constant 0 : index
    %c0_0 = arith.constant 0 : index
    %0 = vector.load %arg2[%c0, %c0_0] : memref<2x128xf32, #tpu.memory_space<vmem>>, vector<2x128xf32>
    %c0_1 = arith.constant 0 : index
    %c0_2 = arith.constant 0 : index
    %1 = vector.load %arg3[%c0_1, %c0_2] : memref<2x128xf32, #tpu.memory_space<vmem>>, vector<2x128xf32>
    %2 = arith.subf %0, %1 : vector<2x128xf32>
    %3 = tpu.reciprocal %0 : vector<2x128xf32> -> vector<2x128xf32>
    %4 = arith.mulf %2, %3 : vector<2x128xf32>
    %5 = arith.mulf %4, %4 : vector<2x128xf32>
    %6 = vector.shape_cast %5 : vector<2x128xf32> to vector<1x2x128xf32>
    %cst = arith.constant dense<0.000000e+00> : vector<1xf32>
    %7 = vector.multi_reduction <add>, %6, %cst [1, 2] : vector<1x2x128xf32> to vector<1xf32>
    %8 = vector.shape_cast %7 : vector<1xf32> to vector<1x1x1xf32>
    %9 = vector.extract %8[0, 0, 0] : f32 from vector<1x1x1xf32>
    %10 = vector.broadcast %9 : f32 to vector<1x1x8x128xf32>
    %c0_3 = arith.constant 0 : index
    %c0_4 = arith.constant 0 : index
    %c0_5 = arith.constant 0 : index
    %c0_6 = arith.constant 0 : index
    %11 = vector.load %arg4[%c0_3, %c0_4, %c0_5, %c0_6] : memref<1x1x8x128xf32, #tpu.memory_space<vmem>>, vector<1x1x8x128xf32>
    tpu.vector_store %arg4[%c0_3, %c0_4, %c0_5, %c0_6], %10 {strides = array<i32>} : memref<1x1x8x128xf32, #tpu.memory_space<vmem>>, vector<1x1x8x128xf32>,
    return
  }
  func.func @transform_0(%arg0: i32, %arg1: i32) -> (i32, i32) {
    %c0_i32 = arith.constant 0 : i32
    return %arg0, %arg1 : i32, i32
  }
  func.func @transform_1(%arg0: i32, %arg1: i32) -> (i32, i32) {
    %c0_i32 = arith.constant 0 : i32
    return %arg0, %arg1 : i32, i32
  }
  func.func @transform_2(%arg0: i32, %arg1: i32) -> (i32, i32, i32, i32) {
    %c0_i32 = arith.constant 0 : i32
    %c0_i32_0 = arith.constant 0 : i32
    %c0_i32_1 = arith.constant 0 : i32
    return %arg0, %arg1, %c0_i32, %c0_i32_0 : i32, i32, i32, i32
  }
}

</mosaic_0001>

<bundles_post_ra>
// kernel: tpu_custom_call.1
= control target key start
LH: loop header
LB: loop body
LE: loop exit
PB: predicated region body
PF: predicated region fallthrough
CT: control target
= control target key end

     0   :  { %7 = vsyncpa [#allocation3], 0  ;;  %s834_s0 = inlined_call_operand.hbm [shape: f32[2,256], index: 0, kind: input, shape index: {}]   ;;  %s835_s1 = inlined_call_operand.hbm [shape: f32[2,256], index: 1, kind: input, shape index: {}]   ;;  %s836_s2 = inlined_call_operand.hbm [shape: f32[1,2,8,128], index: 2, kind: output, shape index: {}]  }
   0x1   :  { %9 = vsyncpa [#allocation3 + $0x1], 0 }
   0x2   :  { %10 = vsyncpa [#allocation6], 0 }
   0x3   :  { %12 = vsyncpa [#allocation6 + $0x1], 0 }
   0x4   :  { %13 = vsyncpa [#allocation4], 0 }
   0x5   :  { %15 = vsyncpa [#allocation4 + $0x1], 0  ;;  %s613_s9 = smov 0   ;;  %s615_s10 = smov 0  }
   0x6   :  { %s617_s11 = smov 0   ;;  %s619_s12 = smov 0  }
   0x7   :  { %s621_s13 = smov 0   ;;  %s623_s14 = smov 0  }
   0x8 LB: > { %s360_s15 = sadd.s32 4294967295, %s593_s14   ;;  %s361_s16 = sadd.s32 4294967294, %s593_s14   ;;  %s593_s14 = sphi %s623_s14, %s21_s14   ;;  %s589_s13 = sphi %s621_s13, %s856_s13   ;;  %s585_s12 = sphi %s619_s12, %s855_s12   ;;  %s581_s11 = sphi %s617_s11, %s854_s11   ;;  %s577_s10 = sphi %s615_s10, %s853_s10   ;;  %s573_s9 = sphi %s613_s9, %s852_s9  }
   0x9   : > { %s30_s17 = sadd.s32 1, %s589_s13  ;;  %s42_s18 = sadd.s32 1, %s581_s11 }
   0xa   : > { %p31_p0 = scmp.ge.s32.totalorder %s30_s17, 2  ;;  %p49_p1 = scmp.ne.s32.totalorder %s581_s11, %s577_s10 }
   0xb   : > { %p50_p2 = scmp.eq.s32.totalorder %s593_s14, 0  ;;  %p55_p3 = scmp.ne.s32.totalorder %s577_s10, %s573_s9 }
   0xc   : > { %s858_s17 = smov (%p31_p0, %s30_s17), 0  ;;  %p56_p5 = scmp.eq.s32.totalorder %s360_s15, 0 }
   0xd   : > { %p654_p4 = por %p50_p2, %p49_p1  ;;  %s38_s20 = ssub.s32 %s589_s13, %s858_s17 }
   0xe   : > { %p109_p6 = scmp.eq.s32.totalorder %s360_s15, 1  ;;  %p40_p7 = scmp.eq.s32.totalorder %s38_s20, 0 }
   0xf   : > { %p660_p8 = por %p56_p5, %p55_p3  ;;  %p115_p10 = scmp.eq.s32.totalorder %s361_s16, 1 }
  0x10   : > { %p664_p9 = por %p109_p6, %p49_p1  ;;  %p395_p13 = scmp.lt.s32.totalorder %s593_s14, 2 }
  0x11   : > { %s840_s21 = scalar_select %p660_p8, 1, 0 }
  0x12   : > { %s841_s22 = scalar_select %p664_p9, 1, 0 }
  0x13   : > { %s669_s23 = scalar_select %p40_p7, %s581_s11, %s42_s18  }
  0x14   : > { %p671_p11 = por %p115_p10, %p55_p3  ;;  %s678_s25 = sand.u32 1, %s581_s11  }
  0x15   : > { %s364_s26 = sshll.u32 %s678_s25, 1  ;;  %s365_s27 = sshll.u32 %s589_s13, 5 }
  0x16   : > { %s842_s24 = scalar_select %p671_p11, 1, 0 }
  0x17   : > { %s687_s30 = scalar_lea.hbm %s834_s0, %s365_s27  ;;  %s139_s3 = scalar_lea.vmem [#allocation2], %s364_s26 }
  0x18   : > { %s148_s4 = sshll.u32 %s139_s3, 4  ;;  %p695_p0 = pnand %p395_p13, %p654_p4  ;;  %s691_s4 = int_to_ptr.vmem [resolvable:$true] %s148_s4 }
  0x19   : > { %s136_s6 = scalar_lea.sflag [#allocation3], %s678_s25  ;;  %s447_s7 = scalar_lea.hbm %s687_s30, 32 }
  0x1a   : > { %p448_p3 = scmp.ne.s32.totalorder %s687_s30, %s447_s7  ;;  %p449_p5 = pneg %p695_p0 }
  0x1b   : > { %s452_s16 = scalar_lea.hbm %s834_s0, 64  ;;  %p453_p4 = scmp.lt.u32.totalorder %s687_s30, %s834_s0 }
  0x1c   : > { %p450_p6 = pnand %p449_p5, %p448_p3  ;;  %p454_p10 = scmp.lt.u32.totalorder %s452_s16, %s447_s7 }
  0x1d   : > { %p456_p12 = scmp.lt.u32.totalorder %s447_s7, %s687_s30 }
  0x1e   : > { %p451_p7 = pneg %p450_p6  ;;  %p455_p13 = por %p454_p10, %p453_p4 }
  0x20   : > { %p457_p1 = por %p456_p12, %p455_p13 }
  0x22   : > { %p458_p2 = pnand %p457_p1, %p451_p7 }
  0x24   : > { %461 = shalt.err (!%p458_p2)
}
  0x25   : > { %s462_s20 = scalar_lea.vmem %s691_s4, 32  ;;  %s595_s28 = smov [#allocation2]  }
  0x26   : > { %p463_p3 = scmp.ne.s32.totalorder %s691_s4, %s462_s20  ;;  %s467_s29 = sshll.u32 %s595_s28, 4  ;;  %s468_s29 = int_to_ptr.vmem [resolvable:$false] %s467_s29 }
  0x27   : > { %s469_s3 = scalar_lea.vmem %s468_s29, 64  ;;  %p470_p9 = scmp.lt.s32.totalorder %s691_s4, %s468_s29 }
  0x28   : > { %p465_p6 = pnand %p463_p3, %p449_p5  ;;  %p471_p4 = scmp.lt.s32.totalorder %s469_s3, %s462_s20 }
  0x2a   : > { %p466_p11 = pneg %p465_p6  ;;  %p472_p10 = por %p471_p4, %p470_p9 }
  0x2c   : > { %p473_p12 = pnand %p472_p10, %p466_p11 }
  0x2e   : > { %476 = shalt.err (!%p473_p12)
}
  0x2f   : > { %387 = dma.hbm_to_vmem [thread:$0]  (!%p695_p0), %s687_s30, 32, %s691_s4, %s136_s6  }
  0x30   : > { %p844_p1 = scmp.lt.s32.totalorder %s593_s14, 3  ;;  %p845_p2 = scmp.ge.s32.totalorder %s593_s14, 1 }
  0x31   : > { %s740_s16 = scalar_lea.hbm %s835_s1, %s365_s27  ;;  %s159_s18 = scalar_lea.vmem [#allocation5], %s364_s26 }
  0x32   : > { %p731_p7 = pnand %p845_p2, %p844_p1  ;;  %s168_s19 = sshll.u32 %s159_s18, 4  ;;  %s169_s19 = int_to_ptr.vmem [resolvable:$true] %s168_s19 }
  0x33   : > { %s156_s30 = scalar_lea.sflag [#allocation6], %s678_s25  ;;  %s477_s4 = scalar_lea.hbm %s740_s16, 32 }
  0x34   : > { %s846_s7 = scalar_select %p731_p7, 1, 0 }
  0x35   : > { %p478_p9 = scmp.ne.s32.totalorder %s740_s16, %s477_s4  ;;  %s482_s27 = scalar_lea.hbm %s835_s1, 64 }
  0x36   : > { %p483_p3 = scmp.lt.u32.totalorder %s740_s16, %s835_s1  ;;  %p484_p6 = scmp.lt.u32.totalorder %s482_s27, %s477_s4 }
  0x37   : > { %p480_p11 = pnand %p478_p9, %p449_p5  ;;  %p486_p10 = scmp.lt.u32.totalorder %s477_s4, %s740_s16 }
  0x38   : > { %p485_p4 = por %p484_p6, %p483_p3 }
  0x39   : > { %p481_p13 = pneg %p480_p11 }
  0x3a   : > { %p487_p12 = por %p486_p10, %p485_p4 }
  0x3c   : > { %p488_p1 = pnand %p487_p12, %p481_p13 }
  0x3e   : > { %491 = shalt.err (!%p488_p1)
}
  0x3f   : > { %s492_s25 = scalar_lea.vmem %s169_s19, 32  ;;  %s596_s26 = smov [#allocation5]  }
  0x40   : > { %p493_p2 = scmp.ne.s32.totalorder %s169_s19, %s492_s25  ;;  %s497_s3 = sshll.u32 %s596_s26, 4  ;;  %s498_s3 = int_to_ptr.vmem [resolvable:$false] %s497_s3 }
  0x41   : > { %s499_s8 = scalar_lea.vmem %s498_s3, 64  ;;  %p500_p8 = scmp.lt.s32.totalorder %s169_s19, %s498_s3 }
  0x42   : > { %p495_p9 = pnand %p493_p2, %p449_p5  ;;  %p501_p7 = scmp.lt.s32.totalorder %s499_s8, %s492_s25 }
  0x44   : > { %p496_p11 = pneg %p495_p9  ;;  %p502_p3 = por %p501_p7, %p500_p8 }
  0x46   : > { %p503_p6 = pnand %p502_p3, %p496_p11 }
  0x48   : > { %506 = shalt.err (!%p503_p6)
}
  0x49   : > { %390 = dma.hbm_to_vmem [thread:$0]  (!%p695_p0), %s740_s16, 32, %s169_s19, %s156_s30  }
  0x4a   : > { %p847_p13 = scmp.ne.s32.totalorder %s846_s7, 0 }
  0x4b   : > { %s767_s15 = sand.u32 (!%p847_p13), 1, %s577_s10   ;;  %p848_p5 = scmp.ne.s32.totalorder (!%p847_p13), %s840_s21, 0 }
  0x4c   : > { %177 = sbr.rel (%p847_p13) target bundleno = 322 (0x142), region = 28  ;;  %s369_s18 = sshll.u32 (!%p847_p13), %s767_s15, 1 }
  0x4d   : > { %s180_s4 = scalar_lea.sflag (!%p847_p13), [#allocation3], %s767_s15  ;;  %s183_s6 = scalar_lea.vmem (!%p847_p13), [#allocation2], %s369_s18 }
  0x53   : > { %560 = dma.done.wait (%p848_p5), %s180_s4, 32  }
  0x54   : > { %562 = vsyncadd (%p848_p5), %s180_s4, 4294967264  ;;  %s189_s5 = scalar_lea.sflag [#allocation6], %s767_s15  ;;  %s192_s16 = scalar_lea.vmem [#allocation5], %s369_s18 }
  0x55   : > { %564 = dma.done.wait (%p848_p5), %s189_s5, 32  }
  0x56   : > { %566 = vsyncadd (%p848_p5), %s189_s5, 4294967264  ;;  %v218_v0 = vld [vmem:[%s183_s6] sm:$0x3]  ;;  %v219_v1 = vld [vmem:[%s192_s16] sm:$0x3]  ;;  %vm224_vm0 = vcmask 1041408  }
  0x57   : > { %445 = vrcp.f32 %v218_v0  ;;  %v220_v2 = vsub.f32 %v218_v0, %v219_v1  ;;  %s371_s21 = sshll.u32 %s767_s15, 3  ;;  %s373_s30 = sshll.u32 %s585_s12, 7 }
  0x58   : > { %s217_s7 = scalar_lea.vmem [#allocation7], %s371_s21  ;;  %s787_s29 = scalar_lea.hbm %s836_s2, %s373_s30 }
  0x59   : > { %s253_s19 = sshll.u32 %s217_s7, 4  ;;  %s238_s25 = scalar_lea.sflag [#allocation4], %s767_s15  ;;  %s782_s19 = int_to_ptr.vmem [resolvable:$true] %s253_s19 }
  0x5a   : > { %s507_s26 = scalar_lea.vmem %s782_s19, 128  ;;  %p849_p0 = scmp.ne.s32.totalorder %s841_s22, 0 }
  0x5b   : > { %p508_p8 = scmp.ne.s32.totalorder %s782_s19, %s507_s26  ;;  %s597_s12 = smov [#allocation7]  }
  0x5c   : > { %s511_s3 = sshll.u32 %s597_s12, 4  ;;  %s512_s3 = int_to_ptr.vmem [resolvable:$false] %s511_s3 }
  0x5d   : > { %p509_p7 = pnand %p508_p8, %p849_p0  ;;  %s513_s8 = scalar_lea.vmem %s512_s3, 256 }
  0x5e   : > { %p514_p10 = scmp.lt.s32.totalorder %s782_s19, %s512_s3  ;;  %p515_p12 = scmp.lt.s32.totalorder %s513_s8, %s507_s26 }
  0x5f   : > { %p510_p4 = pneg %p509_p7 }
  0x60   : > { %p516_p1 = por %p515_p12, %p514_p10 }
  0x61   : > { %v446_v3 = vpop.eup %445 }
  0x62   : > { %v222_v4 = vmul.f32 %v446_v3, %v220_v2  ;;  %p517_p2 = pnand %p516_p1, %p510_p4 }
  0x64   : > { %v223_v5 = vmul.f32 %v222_v4, %v222_v4 }
  0x66   : > { %v225_v6 = vsel %vm224_vm0, %v223_v5, 0.0 }
  0x67   : > { %226 = vadd.xlane.f32.xlu0 %v225_v6 }
  0xf4   : > { %v227_v7 = vpop.xlane.xlu0 %226 }
  0xf5   : > { %v228_v8 = vrot.slane %v227_v7, 4 }
  0xf7   : > { %v229_v9 = vadd.f32 %v228_v8, %v227_v7 }
  0xf9   : > { %v230_v10 = vrot.slane %v229_v9, 2 }
  0xfb   : > { %v231_v11 = vadd.f32 %v230_v10, %v229_v9 }
  0xfd   : > { %v232_v12 = vrot.slane %v231_v11, 1 }
  0xff   : > { %v233_v13 = vadd.f32 %v232_v12, %v231_v11 }
 0x101   : > { %376 = vpush %v233_v13 }
 0x132   : > { %s377_s20 = spop %376 }
 0x133   : > { %v235_v14 = vstv %s377_s20 }
 0x134   : > { %236 = vst [vmem:[%s217_s7] sm:$0xff] %v235_v14 }
 0x135   : > { %520 = shalt.err (!%p517_p2)
}
 0x136   : > { %s521_s15 = scalar_lea.hbm %s787_s29, 128  ;;  %s525_s6 = scalar_lea.hbm %s836_s2, 256 }
 0x137   : > { %p522_p9 = scmp.ne.s32.totalorder %s787_s29, %s521_s15  ;;  %p526_p6 = scmp.lt.u32.totalorder %s787_s29, %s836_s2 }
 0x138   : > { %p527_p13 = scmp.lt.u32.totalorder %s525_s6, %s521_s15  ;;  %p529_p8 = scmp.lt.u32.totalorder %s521_s15, %s787_s29 }
 0x139   : > { %p523_p11 = pnand %p522_p9, %p849_p0 }
 0x13a   : > { %p528_p5 = por %p527_p13, %p526_p6 }
 0x13b   : > { %p524_p3 = pneg %p523_p11 }
 0x13c   : > { %p530_p7 = por %p529_p8, %p528_p5 }
 0x13e   : > { %p531_p4 = pnand %p530_p7, %p524_p3 }
 0x140   : > { %534 = shalt.err (!%p531_p4)
}
 0x141   : > { %382 = dma.vmem_to_hbm [thread:$0]  (%p849_p0), %s782_s19, 128, %s787_s29, %s238_s25  }
 0x142 PF: > { %s265_s21 = sand.u32 1, %s573_s9   ;;  %p850_p10 = scmp.ne.s32.totalorder %s842_s24, 0 }
 0x143   : > { %p851_p12 = scmp.ge.s32.totalorder %s593_s14, 2  ;;  %s266_s7 = scalar_lea.sflag [#allocation4], %s265_s21 }
 0x145   : > { %p392_p1 = pnand %p851_p12, %p850_p10 }
 0x147   : > { %568 = dma.done.wait (!%p392_p1), %s266_s7, 128  }
 0x148   : > { %570 = vsyncadd (!%p392_p1), %s266_s7, 4294967168  ;;  %s21_s14 = sadd.s32 1, %s593_s14   ;;  %s852_s9 = smov %s577_s10 }
 0x149   : > { %p18_p2 = scmp.ge.s32.totalorder %s21_s14, 4   ;;  %s853_s10 = smov %s581_s11 }
 0x14a   : > { %s854_s11 = smov %s669_s23  ;;  %s855_s12 = smov %s589_s13 }
 0x14b   : > { %s856_s13 = smov %s858_s17  ;;  %20 = sbr.rel (!%p18_p2) target bundleno = 8 (0x8), region = 86 }
 0x152   :  { %271 = vsyncpa [#allocation3], 1 }
 0x153   :  { %273 = vsyncpa [#allocation3 + $0x1], 1 }
 0x154   :  { %274 = vsyncpa [#allocation6], 1 }
 0x155   :  { %276 = vsyncpa [#allocation6 + $0x1], 1 }
 0x156   :  { %277 = vsyncpa [#allocation4], 1 }
 0x157   :  { %279 = vsyncpa [#allocation4 + $0x1], 1 }

</bundles_post_ra>
